<compile_context>
chip_gen: v6e
topology: v6e:2x2x1
jax: 0.10.0
libtpu: 0.0.40
codegen_flags: <defaults>
</compile_context>

<pallas_src>
import functools

import jax
import jax.numpy as jnp
from jax.experimental import pallas as pl
from jax.experimental.pallas import tpu as pltpu

BN_EPS = 1e-5


def _prediction_mlp_kernel(x_ref, w1_ref, gamma_ref, beta_ref, w2_ref, b2_ref,
                           o_ref, acc_ref, *, true_n):
    hj = pl.program_id(0)

    @pl.when(hj == 0)
    def _init():
        # b2 folded into the accumulator init (saves an epilogue [N, Dout] add).
        acc_ref[...] = jnp.broadcast_to(b2_ref[...], acc_ref.shape)

    # ---- layer1 partial: bf16 x bf16 -> f32 accumulate on the MXU ----------
    h = jnp.dot(x_ref[...], w1_ref[...],
                preferred_element_type=jnp.float32)            # [Np, th] f32

    # ---- fused BatchNorm1d (training stats) + affine + ReLU, one pass ------
    # sum and sum-of-squares in the same pass; var = E[h^2] - mean^2.
    # Padded batch rows are exactly zero (b1 omitted), so dividing by the true
    # batch size keeps the statistics exact.
    inv_n = jnp.float32(1.0 / true_n)
    mean = jnp.sum(h, axis=0, keepdims=True) * inv_n           # [1, th]
    ex2 = jnp.sum(h * h, axis=0, keepdims=True) * inv_n        # [1, th]
    var = jnp.maximum(ex2 - mean * mean, 0.0)                  # biased variance
    scale = jax.lax.rsqrt(var + BN_EPS) * gamma_ref[...]       # [1, th]
    shift = beta_ref[...] - mean * scale                       # [1, th]
    a = jnp.maximum(h * scale + shift, 0.0)                    # single FMA + ReLU

    # ---- layer2 partial: accumulate over hidden tiles (bf16 in, f32 acc) ---
    acc_ref[...] += jnp.dot(a.astype(jnp.bfloat16), w2_ref[...],
                            preferred_element_type=jnp.float32)

    @pl.when(hj == pl.num_programs(0) - 1)
    def _finalize():
        o_ref[...] = acc_ref[...].astype(o_ref.dtype)


def _pick_tile(dim, preferred=256):
    return preferred if dim % preferred == 0 else dim


def init_params(key, in_dim, hidden_dim, out_dim, dtype=jnp.float32):
    """PyTorch-style init (uniform(-1/sqrt(fan_in), 1/sqrt(fan_in)))."""
    k1, k2, k3, k4 = jax.random.split(key, 4)
    bound1 = 1.0 / jnp.sqrt(in_dim)
    bound2 = 1.0 / jnp.sqrt(hidden_dim)
    return {
        # weights stored as [in_features, out_features] (transposed vs PyTorch)
        "w1": jax.random.uniform(k1, (in_dim, hidden_dim), dtype, -bound1, bound1),
        "b1": jax.random.uniform(k2, (1, hidden_dim), dtype, -bound1, bound1),
        "gamma": jnp.ones((1, hidden_dim), dtype),   # BatchNorm1d default weight
        "beta": jnp.zeros((1, hidden_dim), dtype),   # BatchNorm1d default bias
        "w2": jax.random.uniform(k3, (hidden_dim, out_dim), dtype, -bound2, bound2),
        "b2": jax.random.uniform(k4, (1, out_dim), dtype, -bound2, bound2),
    }


def prepare_params(params, *, th=None):
    """One-time (init-time) weight preprocessing: bf16 casts + contiguous w1 tiles.

    w1 is stored as [nh, Din, th] so each streamed hidden tile is one contiguous
    HBM region (single DMA) instead of Din strided rows of th*2 bytes.
    """
    w1 = params["w1"]
    Din, H = w1.shape
    Dout = params["w2"].shape[1]
    if th is None:
        th = _pick_tile(H, 256)
    assert H % th == 0 and (th % 128 == 0 or th == H), \
        "hidden tile must be a multiple of 128 (or the full hidden dim)"
    nh = H // th
    w1t = jnp.transpose(w1.astype(jnp.bfloat16).reshape(Din, nh, th), (1, 0, 2))
    return {
        "w1t": w1t,                                              # [nh, Din, th] bf16
        "gamma": params["gamma"].astype(jnp.float32).reshape(1, H),
        "beta": params["beta"].astype(jnp.float32).reshape(1, H),
        "w2": params["w2"].astype(jnp.bfloat16),                 # [H, Dout] bf16
        "b2": params["b2"].astype(jnp.float32).reshape(1, Dout),
    }


@functools.partial(jax.jit, static_argnames=("out_dtype", "weight_buffers"))
def prediction_mlp(x, prepared, *, out_dtype=jnp.float32, weight_buffers=2):
    """x: [N, in_dim] f32/bf16.  prepared: output of prepare_params.  -> [N, out_dim]."""
    w1t, gamma, beta, w2, b2 = (prepared["w1t"], prepared["gamma"],
                                prepared["beta"], prepared["w2"], prepared["b2"])
    nh, Din, th = w1t.shape
    H = nh * th
    Dout = w2.shape[1]
    N, Din_x = x.shape
    assert Din_x == Din, "x feature dim does not match w1"

    # Pad the batch to a sublane multiple (exact; see header).  Ideally callers
    # use N >= 128/256 so the MXU rows are well occupied.
    pad = (-N) % 8
    if pad:
        x = jnp.pad(x, ((0, pad), (0, 0)))
    Np = N + pad
    xb = x.astype(jnp.bfloat16)

    out_bytes = jnp.dtype(out_dtype).itemsize
    # VMEM residency estimate: x single-buffered, streamed weight tiles
    # multi-buffered, f32 accumulator, output block.
    vmem_est = (Np * Din * 2
                + weight_buffers * Din * th * 2
                + weight_buffers * th * Dout * 2
                + 2 * 2 * th * 4
                + Dout * 4
                + Np * Dout * 4
                + 2 * Np * Dout * out_bytes)
    assert vmem_est <= 56 * 2**20, (
        f"prediction_mlp needs ~{vmem_est / 2**20:.1f} MiB of VMEM; reduce the "
        "batch size N or the hidden tile th (v7x has only 64 MiB per TensorCore).")
    vmem_limit = int(min(max(vmem_est + 8 * 2**20, 32 * 2**20), 64 * 2**20))

    cost = pl.CostEstimate(
        flops=2 * Np * Din * H + 2 * Np * H * Dout,
        transcendentals=H,
        bytes_accessed=(Np * Din * 2 + Din * H * 2 + H * Dout * 2
                        + 2 * H * 4 + Dout * 4 + Np * Dout * out_bytes),
    )

    # On v5e (short grids, lower HBM bandwidth) weight_buffers=3 can hide the
    # startup DMA of the streamed tiles; default 2 uses the standard pipeline.
    wmode = pl.Buffered(weight_buffers) if weight_buffers != 2 else None

    grid_spec = pltpu.PrefetchScalarGridSpec(
        num_scalar_prefetch=0,
        grid=(nh,),                                            # hidden-reduction axis only
        in_specs=[
            pl.BlockSpec((Np, Din), lambda hj: (0, 0),
                         pipeline_mode=pl.Buffered(1)),        # x: resident, single buffer
            pl.BlockSpec((None, Din, th), lambda hj: (hj, 0, 0),
                         pipeline_mode=wmode),                 # w1 tile (contiguous DMA)
            pl.BlockSpec((1, th), lambda hj: (0, hj)),         # gamma tile
            pl.BlockSpec((1, th), lambda hj: (0, hj)),         # beta tile
            pl.BlockSpec((th, Dout), lambda hj: (hj, 0),
                         pipeline_mode=wmode),                 # w2 row-tile (contiguous)
            pl.BlockSpec((1, Dout), lambda hj: (0, 0),
                         pipeline_mode=pl.Buffered(1)),        # b2: resident, single buffer
        ],
        out_specs=pl.BlockSpec((Np, Dout), lambda hj: (0, 0)),
        scratch_shapes=[pltpu.VMEM((Np, Dout), jnp.float32)],  # layer2 f32 accumulator
    )

    out = pl.pallas_call(
        functools.partial(_prediction_mlp_kernel, true_n=N),
        out_shape=jax.ShapeDtypeStruct((Np, Dout), out_dtype),
        grid_spec=grid_spec,
        compiler_params=pltpu.CompilerParams(
            dimension_semantics=("arbitrary",),
            vmem_limit_bytes=vmem_limit,
        ),
        cost_estimate=cost,
    )(xb, w1t, gamma, beta, w2, b2)

    return out[:N] if pad else out


def reference_forward(x, params):
    """Pure-JAX reference mirroring the PyTorch module (b1 included; it is
    cancelled by BN).  Matmul operands mirror the kernel's bf16-in / f32-acc."""
    xb = x.astype(jnp.bfloat16).astype(jnp.float32)
    w1 = params["w1"].astype(jnp.bfloat16).astype(jnp.float32)
    w2 = params["w2"].astype(jnp.bfloat16).astype(jnp.float32)
    h = xb @ w1 + params["b1"]
    mean = jnp.mean(h, axis=0, keepdims=True)
    var = jnp.mean((h - mean) ** 2, axis=0, keepdims=True)
    h = (h - mean) * jax.lax.rsqrt(var + BN_EPS) * params["gamma"] + params["beta"]
    h = jnp.maximum(h, 0.0)
    h = h.astype(jnp.bfloat16).astype(jnp.float32)
    return h @ w2 + params["b2"]


if __name__ == "__main__":
    # Small shapes consistent with the bottleneck MLP structure (feature dims
    # are 128-multiples so blocked specs satisfy the (8,128) tiling rule).
    N, IN_DIM, HIDDEN_DIM, OUT_DIM = 32, 256, 256, 256

    key = jax.random.PRNGKey(0)
    kx, kp = jax.random.split(key)
    x = jax.random.normal(kx, (N, IN_DIM), dtype=jnp.float32)
    params = init_params(kp, IN_DIM, HIDDEN_DIM, OUT_DIM)

    # th=128 -> nh=2: exercises the pre-tiled w1, the streamed-weight pipeline
    # and the hidden-reduction accumulation.
    prepared = prepare_params(params, th=128)
    out = prediction_mlp(x, prepared)
    out = jax.block_until_ready(out)

    ref = reference_forward(x, params)
    assert out.shape == (N, OUT_DIM)
    assert out.dtype == jnp.float32
    assert jnp.allclose(out, ref, atol=1e-2, rtol=1e-2), "mismatch vs reference"

    print("KERNEL_OK")
</pallas_src>

<mosaic_0001>
module attributes {stable_mosaic.version = 11 : i64} {
  func.func @_prediction_mlp_kernel(%arg0: i32, %arg1: memref<32x256xbf16, #tpu.memory_space<vmem>>, %arg2: memref<1x256x128xbf16, #tpu.memory_space<vmem>>, %arg3: memref<1x128xf32, #tpu.memory_space<vmem>>, %arg4: memref<1x128xf32, #tpu.memory_space<vmem>>, %arg5: memref<128x256xbf16, #tpu.memory_space<vmem>>, %arg6: memref<1x256xf32, #tpu.memory_space<vmem>>, %arg7: memref<32x256xf32, #tpu.memory_space<vmem>>, %arg8: memref<32x256xf32, #tpu.memory_space<vmem>>) attributes {dimension_semantics = [#tpu.dimension_semantics<arbitrary>], iteration_bounds = array<i64: 2>, scalar_prefetch = 0 : i64, scratch_operands = 1 : i64, tpu.core_type = #tpu.core_type<tc>, window_params = [{pipeline_mode = #tpu.pipeline_mode<synchronous>, transform_indices = @transform_0, window_bounds = array<i64: 32, 256>}, {transform_indices = @transform_1, window_bounds = array<i64: 1, 256, 128>}, {transform_indices = @transform_2, window_bounds = array<i64: 1, 128>}, {transform_indices = @transform_3, window_bounds = array<i64: 1, 128>}, {transform_indices = @transform_4, window_bounds = array<i64: 128, 256>}, {pipeline_mode = #tpu.pipeline_mode<synchronous>, transform_indices = @transform_5, window_bounds = array<i64: 1, 256>}, {pipeline_mode = #tpu.pipeline_mode<synchronous>, transform_indices = @transform_6, window_bounds = array<i64: 32, 256>}]} {
    %c0_i32 = arith.constant 0 : i32
    %0 = arith.cmpi eq, %arg0, %c0_i32 : i32
    %1 = arith.extui %0 : i1 to i32
    %c0_i32_0 = arith.constant 0 : i32
    %2 = arith.cmpi ne, %1, %c0_i32_0 : i32
    scf.if %2 {
      %c0_24 = arith.constant 0 : index
      %c0_25 = arith.constant 0 : index
      %43 = vector.load %arg6[%c0_24, %c0_25] : memref<1x256xf32, #tpu.memory_space<vmem>>, vector<1x256xf32>
      %44 = vector.shape_cast %43 : vector<1x256xf32> to vector<1x256xf32>
      %45 = vector.broadcast %44 : vector<1x256xf32> to vector<32x256xf32>
      %c0_26 = arith.constant 0 : index
      %c0_27 = arith.constant 0 : index
      %46 = vector.load %arg8[%c0_26, %c0_27] : memref<32x256xf32, #tpu.memory_space<vmem>>, vector<32x256xf32>
      tpu.vector_store %arg8[%c0_26, %c0_27], %45 {strides = array<i32>} : memref<32x256xf32, #tpu.memory_space<vmem>>, vector<32x256xf32>,
    } else {
    }
    %c0 = arith.constant 0 : index
    %c0_1 = arith.constant 0 : index
    %3 = vector.load %arg1[%c0, %c0_1] : memref<32x256xbf16, #tpu.memory_space<vmem>>, vector<32x256xbf16>
    %c0_2 = arith.constant 0 : index
    %c0_3 = arith.constant 0 : index
    %c0_4 = arith.constant 0 : index
    %4 = vector.load %arg2[%c0_2, %c0_3, %c0_4] : memref<1x256x128xbf16, #tpu.memory_space<vmem>>, vector<1x256x128xbf16>
    %5 = vector.shape_cast %4 : vector<1x256x128xbf16> to vector<256x128xbf16>
    %cst = arith.constant dense<0.000000e+00> : vector<32x128xf32>
    %6 = tpu.matmul %3, %5, %cst {dimension_numbers = #tpu.dot_dimension_numbers<[1], [0], [0], [1], [0, 0, 1, 1], [], []>} : vector<32x256xbf16>, vector<256x128xbf16>, vector<32x128xf32> -> vector<32x128xf32>
    %cst_5 = arith.constant dense<0.000000e+00> : vector<128xf32>
    %7 = vector.multi_reduction <add>, %6, %cst_5 [0] : vector<32x128xf32> to vector<128xf32>
    %8 = vector.shape_cast %7 : vector<128xf32> to vector<1x128xf32>
    %cst_6 = arith.constant 3.125000e-02 : f32
    %9 = vector.broadcast %cst_6 : f32 to vector<1x128xf32>
    %10 = arith.mulf %8, %9 : vector<1x128xf32>
    %11 = arith.mulf %6, %6 : vector<32x128xf32>
    %cst_7 = arith.constant dense<0.000000e+00> : vector<128xf32>
    %12 = vector.multi_reduction <add>, %11, %cst_7 [0] : vector<32x128xf32> to vector<128xf32>
    %13 = vector.shape_cast %12 : vector<128xf32> to vector<1x128xf32>
    %cst_8 = arith.constant 3.125000e-02 : f32
    %14 = vector.broadcast %cst_8 : f32 to vector<1x128xf32>
    %15 = arith.mulf %13, %14 : vector<1x128xf32>
    %16 = arith.mulf %10, %10 : vector<1x128xf32>
    %17 = arith.subf %15, %16 : vector<1x128xf32>
    %cst_9 = arith.constant 0.000000e+00 : f32
    %18 = vector.broadcast %cst_9 : f32 to vector<1x128xf32>
    %19 = arith.maximumf %17, %18 : vector<1x128xf32>
    %cst_10 = arith.constant 9.99999974E-6 : f32
    %20 = vector.broadcast %cst_10 : f32 to vector<1x128xf32>
    %21 = arith.addf %19, %20 : vector<1x128xf32>
    %22 = math.rsqrt %21 : vector<1x128xf32>
    %c0_11 = arith.constant 0 : index
    %c0_12 = arith.constant 0 : index
    %23 = vector.load %arg3[%c0_11, %c0_12] : memref<1x128xf32, #tpu.memory_space<vmem>>, vector<1x128xf32>
    %24 = arith.mulf %22, %23 : vector<1x128xf32>
    %c0_13 = arith.constant 0 : index
    %c0_14 = arith.constant 0 : index
    %25 = vector.load %arg4[%c0_13, %c0_14] : memref<1x128xf32, #tpu.memory_space<vmem>>, vector<1x128xf32>
    %26 = arith.mulf %10, %24 : vector<1x128xf32>
    %27 = arith.subf %25, %26 : vector<1x128xf32>
    %28 = vector.broadcast %24 : vector<1x128xf32> to vector<32x128xf32>
    %29 = arith.mulf %6, %28 : vector<32x128xf32>
    %30 = vector.broadcast %27 : vector<1x128xf32> to vector<32x128xf32>
    %31 = arith.addf %29, %30 : vector<32x128xf32>
    %cst_15 = arith.constant 0.000000e+00 : f32
    %32 = vector.broadcast %cst_15 : f32 to vector<32x128xf32>
    %33 = arith.maximumf %31, %32 : vector<32x128xf32>
    %c0_16 = arith.constant 0 : index
    %c0_17 = arith.constant 0 : index
    %34 = vector.load %arg8[%c0_16, %c0_17] : memref<32x256xf32, #tpu.memory_space<vmem>>, vector<32x256xf32>
    %35 = arith.truncf %33 : vector<32x128xf32> to vector<32x128xbf16>
    %c0_18 = arith.constant 0 : index
    %c0_19 = arith.constant 0 : index
    %36 = vector.load %arg5[%c0_18, %c0_19] : memref<128x256xbf16, #tpu.memory_space<vmem>>, vector<128x256xbf16>
    %cst_20 = arith.constant dense<0.000000e+00> : vector<32x256xf32>
    %37 = tpu.matmul %35, %36, %cst_20 {dimension_numbers = #tpu.dot_dimension_numbers<[1], [0], [0], [1], [0, 0, 1, 1], [], []>} : vector<32x128xbf16>, vector<128x256xbf16>, vector<32x256xf32> -> vector<32x256xf32>
    %38 = arith.addf %34, %37 : vector<32x256xf32>
    %c0_21 = arith.constant 0 : index
    %c0_22 = arith.constant 0 : index
    %39 = vector.load %arg8[%c0_21, %c0_22] : memref<32x256xf32, #tpu.memory_space<vmem>>, vector<32x256xf32>
    tpu.vector_store %arg8[%c0_21, %c0_22], %38 {strides = array<i32>} : memref<32x256xf32, #tpu.memory_space<vmem>>, vector<32x256xf32>,
    %c1_i32 = arith.constant 1 : i32
    %40 = arith.cmpi eq, %arg0, %c1_i32 : i32
    %41 = arith.extui %40 : i1 to i32
    %c0_i32_23 = arith.constant 0 : i32
    %42 = arith.cmpi ne, %41, %c0_i32_23 : i32
    scf.if %42 {
      %c0_24 = arith.constant 0 : index
      %c0_25 = arith.constant 0 : index
      %43 = vector.load %arg8[%c0_24, %c0_25] : memref<32x256xf32, #tpu.memory_space<vmem>>, vector<32x256xf32>
      %c0_26 = arith.constant 0 : index
      %c0_27 = arith.constant 0 : index
      %44 = vector.load %arg7[%c0_26, %c0_27] : memref<32x256xf32, #tpu.memory_space<vmem>>, vector<32x256xf32>
      tpu.vector_store %arg7[%c0_26, %c0_27], %43 {strides = array<i32>} : memref<32x256xf32, #tpu.memory_space<vmem>>, vector<32x256xf32>,
    } else {
    }
    return
  }
  func.func @transform_0(%arg0: i32) -> (i32, i32) {
    %c0_i32 = arith.constant 0 : i32
    %c0_i32_0 = arith.constant 0 : i32
    %c0_i32_1 = arith.constant 0 : i32
    return %c0_i32, %c0_i32_0 : i32, i32
  }
  func.func @transform_1(%arg0: i32) -> (i32, i32, i32) {
    %c0_i32 = arith.constant 0 : i32
    %c0_i32_0 = arith.constant 0 : i32
    %c0_i32_1 = arith.constant 0 : i32
    return %arg0, %c0_i32, %c0_i32_0 : i32, i32, i32
  }
  func.func @transform_2(%arg0: i32) -> (i32, i32) {
    %c0_i32 = arith.constant 0 : i32
    %c0_i32_0 = arith.constant 0 : i32
    return %c0_i32, %arg0 : i32, i32
  }
  func.func @transform_3(%arg0: i32) -> (i32, i32) {
    %c0_i32 = arith.constant 0 : i32
    %c0_i32_0 = arith.constant 0 : i32
    return %c0_i32, %arg0 : i32, i32
  }
  func.func @transform_4(%arg0: i32) -> (i32, i32) {
    %c0_i32 = arith.constant 0 : i32
    %c0_i32_0 = arith.constant 0 : i32
    return %arg0, %c0_i32 : i32, i32
  }
  func.func @transform_5(%arg0: i32) -> (i32, i32) {
    %c0_i32 = arith.constant 0 : i32
    %c0_i32_0 = arith.constant 0 : i32
    %c0_i32_1 = arith.constant 0 : i32
    return %c0_i32, %c0_i32_0 : i32, i32
  }
  func.func @transform_6(%arg0: i32) -> (i32, i32) {
    %c0_i32 = arith.constant 0 : i32
    %c0_i32_0 = arith.constant 0 : i32
    %c0_i32_1 = arith.constant 0 : i32
    return %c0_i32, %c0_i32_0 : i32, i32
  }
}

</mosaic_0001>

<bundles_post_ra>
// kernel: prediction_mlp.1
= control target key start
LH: loop header
LB: loop body
LE: loop exit
PB: predicated region body
PF: predicated region fallthrough
CT: control target
= control target key end

     0   :  { %11 = vsyncpa [#allocation4], 0  ;;  %s1510_s0 = inlined_call_operand.vmem [shape: bf16[32,256], index: 0, kind: input, shape index: {}]   ;;  %s1511_s1 = inlined_call_operand.hbm [shape: bf16[2,256,128], index: 1, kind: input, shape index: {}]   ;;  %s1512_s2 = inlined_call_operand.vmem [shape: f32[1,256], index: 2, kind: input, shape index: {}]   ;;  %s1513_s3 = inlined_call_operand.vmem [shape: f32[1,256], index: 3, kind: input, shape index: {}]   ;;  %s1514_s4 = inlined_call_operand.hbm [shape: bf16[256,256], index: 4, kind: input, shape index: {}]   ;;  %s1515_s5 = inlined_call_operand.vmem [shape: f32[1,256], index: 5, kind: input, shape index: {}]   ;;  %s1516_s6 = inlined_call_operand.hbm [shape: f32[32,256], index: 6, kind: output, shape index: {}]  }
   0x1   :  { %13 = vsyncpa [#allocation4 + $0x1], 0 }
   0x2   :  { %14 = vsyncpa [#allocation7], 0 }
   0x3   :  { %16 = vsyncpa [#allocation7 + $0x1], 0 }
   0x4   :  { %17 = vsyncpa [#allocation5], 0  ;;  %s1266_s21 = smov 0   ;;  %s1268_s22 = smov 0  }
   0x5   :  { %s1270_s23 = smov 0   ;;  %s1272_s24 = smov 0  }
   0x6 LB: > { %s1285_s25 = sadd.s32 4294967295, %s1219_s24   ;;  %s1288_s26 = sadd.s32 1, %s1219_s24   ;;  %s1219_s24 = sphi %s1272_s24, %s1526_s24   ;;  %s1215_s23 = sphi %s1270_s23, %s1525_s23   ;;  %s1211_s22 = sphi %s1268_s22, %s1524_s22   ;;  %s1207_s21 = sphi %s1266_s21, %s1523_s21  }
   0x7   : > { %s48_s27 = ssub.s32 %s1219_s24, %s1288_s26  ;;  %s51_s28 = sadd.s32 1, %s1215_s23 }
   0x8   : > { %p49_p0 = scmp.eq.s32.totalorder %s48_s27, 0  ;;  %p58_p1 = scmp.ne.s32.totalorder %s1215_s23, %s1211_s22 }
   0x9   : > { %p59_p2 = scmp.eq.s32.totalorder %s1219_s24, 0  ;;  %p64_p3 = scmp.ne.s32.totalorder %s1211_s22, %s1207_s21 }
   0xa   : > { %s1298_s29 = scalar_select %p49_p0, %s1215_s23, %s51_s28  }
   0xb   : > { %p60_p4 = por %p59_p2, %p58_p1  ;;  %p65_p5 = scmp.eq.s32.totalorder %s1285_s25, 0 }
   0xc   : > { %p1006_p6 = scmp.lt.s32.totalorder %s1219_s24, 2  ;;  %s1307_s7 = sand.u32 1, %s1215_s23  }
   0xd   : > { %p1302_p7 = por %p65_p5, %p64_p3  ;;  %s908_s8 = sshll.u32 %s1307_s7, 7 }
   0xe   : > { %s960_s9 = sshll.u32 %s1219_s24, 11  ;;  %s218_s13 = scalar_lea.vmem [#allocation3], %s908_s8 }
   0xf   : > { %s1518_s30 = scalar_select %p1302_p7, 1, 0 }
  0x10   : > { %s1316_s12 = scalar_lea.hbm %s1511_s1, %s960_s9  ;;  %s225_s14 = sshll.u32 %s218_s13, 4  ;;  %s1320_s14 = int_to_ptr.vmem [resolvable:$true] %s225_s14 }
  0x11   : > { %p1322_p8 = pnand %p1006_p6, %p60_p4  ;;  %s215_s16 = scalar_lea.sflag [#allocation4], %s1307_s7 }
  0x12   : > { %s1097_s17 = scalar_lea.hbm %s1316_s12, 2048  ;;  %s1102_s20 = scalar_lea.hbm %s1511_s1, 4096 }
  0x13   : > { %p1098_p10 = scmp.ne.s32.totalorder %s1316_s12, %s1097_s17  ;;  %p1099_p11 = pneg %p1322_p8 }
  0x14   : > { %p1103_p0 = scmp.lt.s32.totalorder %s1316_s12, %s1511_s1  ;;  %p1104_p1 = scmp.lt.s32.totalorder %s1102_s20, %s1097_s17 }
  0x15   : > { %p1100_p12 = pnand %p1099_p11, %p1098_p10 }
  0x16   : > { %p1105_p2 = por %p1104_p1, %p1103_p0 }
  0x17   : > { %p1101_p13 = pneg %p1100_p12 }
  0x19   : > { %p1106_p3 = pnand %p1105_p2, %p1101_p13 }
  0x1b   : > { %1109 = shalt.err (!%p1106_p3)
}
  0x1c   : > { %s1110_s28 = scalar_lea.vmem %s1320_s14, 2048  ;;  %s1221_s10 = smov [#allocation3]  }
  0x1d   : > { %p1111_p4 = scmp.ne.s32.totalorder %s1320_s14, %s1110_s28  ;;  %s1115_s11 = sshll.u32 %s1221_s10, 4  ;;  %s1116_s11 = int_to_ptr.vmem [resolvable:$false] %s1115_s11 }
  0x1e   : > { %s1117_s13 = scalar_lea.vmem %s1116_s11, 4096  ;;  %p1118_p10 = scmp.lt.s32.totalorder %s1320_s14, %s1116_s11 }
  0x1f   : > { %p1113_p5 = pnand %p1111_p4, %p1099_p11  ;;  %p1119_p12 = scmp.lt.s32.totalorder %s1117_s13, %s1110_s28 }
  0x21   : > { %p1114_p6 = pneg %p1113_p5  ;;  %p1120_p9 = por %p1119_p12, %p1118_p10 }
  0x23   : > { %p1121_p0 = pnand %p1120_p9, %p1114_p6 }
  0x25   : > { %1124 = shalt.err (!%p1121_p0)
}
  0x26   : > { %s1222_s17 = smov 64   ;;  %s1223_s18 = smov 4  }
  0x27   : > { %1002 = dma.hbm_to_vmem [thread:$0]  (!%p1322_p8), %s1316_s12, 2048, %s1320_s14, %s215_s16, %s1222_s17, %s1222_s17, %s1223_s18  }
  0x28   : > { %p267_p13 = scmp.lt.s32.totalorder %s1219_s24, 3  ;;  %s1360_s21 = scalar_lea.hbm %s1514_s4, %s960_s9 }
  0x29   : > { %p1520_p9 = scmp.ge.s32.totalorder %s1219_s24, 1  ;;  %s251_s28 = scalar_lea.vmem [#allocation6], %s908_s8 }
  0x2a   : > { %s259_s10 = sshll.u32 %s251_s28, 4  ;;  %s248_s12 = scalar_lea.sflag [#allocation7], %s1307_s7  ;;  %s1370_s10 = int_to_ptr.vmem [resolvable:$true] %s259_s10 }
  0x2b   : > { %p1364_p1 = pnand %p1520_p9, %p267_p13  ;;  %s1125_s14 = scalar_lea.hbm %s1360_s21, 2048 }
  0x2c   : > { %p1126_p2 = scmp.ne.s32.totalorder %s1360_s21, %s1125_s14  ;;  %s1130_s16 = scalar_lea.hbm %s1514_s4, 4096 }
  0x2d   : > { %p1131_p5 = scmp.lt.s32.totalorder %s1360_s21, %s1514_s4  ;;  %p1132_p6 = scmp.lt.s32.totalorder %s1130_s16, %s1125_s14 }
  0x2e   : > { %p1128_p3 = pnand %p1126_p2, %p1099_p11 }
  0x2f   : > { %p1133_p10 = por %p1132_p6, %p1131_p5 }
  0x30   : > { %p1129_p4 = pneg %p1128_p3 }
  0x32   : > { %p1134_p12 = pnand %p1133_p10, %p1129_p4 }
  0x34   : > { %1137 = shalt.err (!%p1134_p12)
}
  0x35   : > { %s1138_s8 = scalar_lea.vmem %s1370_s10, 2048  ;;  %s1224_s17 = smov [#allocation6]  }
  0x36   : > { %p1139_p0 = scmp.ne.s32.totalorder %s1370_s10, %s1138_s8  ;;  %s1143_s18 = sshll.u32 %s1224_s17, 4  ;;  %s1144_s18 = int_to_ptr.vmem [resolvable:$false] %s1143_s18 }
  0x37   : > { %s1145_s19 = scalar_lea.vmem %s1144_s18, 4096  ;;  %p1146_p2 = scmp.lt.s32.totalorder %s1370_s10, %s1144_s18 }
  0x38   : > { %p1141_p13 = pnand %p1139_p0, %p1099_p11  ;;  %p1147_p3 = scmp.lt.s32.totalorder %s1145_s19, %s1138_s8 }
  0x3a   : > { %p1142_p9 = pneg %p1141_p13  ;;  %p1148_p7 = por %p1147_p3, %p1146_p2 }
  0x3c   : > { %p1149_p5 = pnand %p1148_p7, %p1142_p9 }
  0x3e   : > { %1152 = shalt.err (!%p1149_p5)
}
  0x3f   : > { %s1225_s20 = smov 128   ;;  %s1226_s28 = smov 8  }
  0x40   : > { %1005 = dma.hbm_to_vmem [thread:$0]  (!%p1322_p8), %s1360_s21, 2048, %s1370_s10, %s248_s12, %s1225_s20, %s1225_s20, %s1226_s28  }
  0x41   : > { %271 = sbr.rel (%p1364_p1) target bundleno = 621 (0x26d), region = 44  ;;  %s273_s14 = sand.u32 (!%p1364_p1), 1, %s1211_s22  }
  0x42   : > { %s916_s24 = sshll.u32 (!%p1364_p1), %s273_s14, 7  ;;  %s274_s9 = scalar_lea.sflag (!%p1364_p1), [#allocation4], %s273_s14 }
  0x43   : > { %s1400_s16 = scalar_lea.vmem (!%p1364_p1), [#allocation3], %s916_s24  ;;  %p1522_p7 = scmp.ne.s32.totalorder (!%p1364_p1), %s1518_s30, 0 }
  0x46   : > { %1194 = dma.done.wait (%p1522_p7), %s274_s9, 2048  }
  0x47   : > { %1196 = vsyncadd (%p1522_p7), %s274_s9, 4294965248  ;;  %s283_s11 = scalar_lea.sflag [#allocation7], %s273_s14  ;;  %s1406_s15 = scalar_lea.vmem [#allocation6], %s916_s24 }
  0x48   : > { %1198 = dma.done.wait (%p1522_p7), %s283_s11, 2048  }
  0x49   : > { %1200 = vsyncadd (%p1522_p7), %s283_s11, 4294965248  ;;  %p321_p8 = scmp.lt.s32.totalorder %s1285_s25, 1  ;;  %p918_p11 = scmp.ne.s32.totalorder %s1285_s25, 0 }
  0x4b   : > { %s1414_s7 = scalar_select %p321_p8, %s1285_s25, 1 }
  0x4c   : > { %332 = sbr.rel (%p918_p11) target bundleno = 93 (0x5d), region = 56 }
  0x4d   : > { %s323_s10 = scalar_lea.vmem %s1512_s2, %s1414_s7  ;;  %s326_s8 = scalar_lea.vmem %s1513_s3, %s1414_s7 }
  0x51   : > { %v335_v0 = vlaneseq  ;;  %v333_v2 = vld [vmem:[%s1515_s5] sm:$0x3] }
  0x53   : > { %v336_v1 = vshrl.u32 %v335_v0, 7 }
  0x55   : > { %v337_v3 = vsub.s32 0, %v336_v1  ;;  %v341_v4 = vsub.s32 1, %v336_v1 }
  0x57   : > { %v338_v5 = vrot.slane %v333_v2, %v337_v3  ;;  %v342_v6 = vrot.slane %v333_v2, %v341_v4 }
  0x59   : > { %345 = vst [vmem:[#allocation2 + $0x30] sm:$0xff] %v338_v5  ;;  %347 = vst [vmem:[#allocation2 + $0x18] sm:$0xff] %v338_v5 }
  0x5a   : > { %349 = vst [vmem:[#allocation2 + $0x8] sm:$0xff] %v338_v5  ;;  %351 = vst [vmem:[#allocation2 + $0x28] sm:$0xff] %v338_v5 }
  0x5b   : > { %346 = vst [vmem:[#allocation2] sm:$0xff] %v342_v6  ;;  %348 = vst [vmem:[#allocation2 + $0x10] sm:$0xff] %v342_v6 }
  0x5c   : > { %350 = vst [vmem:[#allocation2 + $0x20] sm:$0xff] %v342_v6  ;;  %352 = vst [vmem:[#allocation2 + $0x38] sm:$0xff] %v342_v6 }
  0x5d PF: > { %v1049_v7 = vld [vmem:[%s1400_s16 + $0x78] sm:$0xff]   ;;  %v1051_v9 = vld [vmem:[%s1400_s16 + $0x70] sm:$0xff]   ;;  %v1053_v11 = vld [vmem:[%s1400_s16 + $0x68] sm:$0xff]   ;;  %v1227_v42 = vmov 0   ;;  %p955_p1 = scmp.ne.s32.totalorder %s1285_s25, 1 }
  0x5e   : > { %v1050_v8 = vld [vmem:[%s1400_s16 + $0x38] sm:$0xff]   ;;  %963 = vmatprep.subr.bf16.mxu0 %v1049_v7  ;;  %v1052_v10 = vld [vmem:[%s1400_s16 + $0x30] sm:$0xff]   ;;  %v1054_v12 = vld [vmem:[%s1400_s16 + $0x28] sm:$0xff]   ;;  %748 = vmatprep.mubr.bf16.mxu1 %v1227_v42 }
  0x5f   : > { %964 = vmatpush3.bf16.msra.mxu0 %v1050_v8  ;;  %v1055_v13 = vld [vmem:[%s1400_s16 + $0x60] sm:$0xff]   ;;  %v1057_v15 = vld [vmem:[%s1400_s16 + $0x58] sm:$0xff]   ;;  %v1059_v17 = vld [vmem:[%s1400_s16 + $0x50] sm:$0xff]  }
  0x60   : > { %965 = vmatprep.subr.bf16.mxu0 %v1051_v9  ;;  %v1056_v14 = vld [vmem:[%s1400_s16 + $0x20] sm:$0xff]   ;;  %v1058_v16 = vld [vmem:[%s1400_s16 + $0x18] sm:$0xff]   ;;  %v1060_v19 = vld [vmem:[%s1400_s16 + $0x10] sm:$0xff]  }
  0x61   : > { %v1067_v18 = vld [vmem:[%s1510_s0 + $0x4] ss:$8 sps:$4 sm:$0xff]   ;;  %v1065_v24 = vld [vmem:[%s1510_s0] ss:$8 sps:$4 sm:$0xff]   ;;  %v1068_v25 = vld [vmem:[%s1510_s0 + $0x14] ss:$8 sps:$4 sm:$0xff]  }
  0x62   : > { %v1061_v20 = vld [vmem:[%s1400_s16 + $0x48] sm:$0xff]   ;;  %537 = vmatprep.mubr.bf16.mxu0 %v1067_v18  ;;  %v1063_v22 = vld [vmem:[%s1400_s16 + $0x40] sm:$0xff]   ;;  %v1070_v26 = vld [vmem:[%s1510_s0 + $0x10] ss:$8 sps:$4 sm:$0xff]  }
  0x63   : > { %966 = vmatpush3.bf16.msra.mxu0 %v1052_v10  ;;  %v1062_v21 = vld [vmem:[%s1400_s16 + $0x8] sm:$0xff]   ;;  %v1064_v23 = vld [vmem:[%s1400_s16] sm:$0xff]   ;;  %v1071_v27 = vld [vmem:[%s1406_s15 + $0x74] ss:$8 sps:$4 sm:$0xff]  }
  0x64   : > { %967 = vmatprep.subr.bf16.mxu0 %v1053_v11  ;;  %v1073_v28 = vld [vmem:[%s1406_s15 + $0x70] ss:$8 sps:$4 sm:$0xff]   ;;  %716 = vmatprep.subr.bf16.mxu1 %v1071_v27  ;;  %v1074_v29 = vld [vmem:[%s1406_s15 + $0x64] ss:$8 sps:$4 sm:$0xff]   ;;  %v1076_v30 = vld [vmem:[%s1406_s15 + $0x60] ss:$8 sps:$4 sm:$0xff]  }
  0x65   : > { %717 = vmatpush1.bf16.msra.mxu1 %v1073_v28  ;;  %v1077_v31 = vld [vmem:[%s1406_s15 + $0x54] ss:$8 sps:$4 sm:$0xff]   ;;  %v1079_v32 = vld [vmem:[%s1406_s15 + $0x50] ss:$8 sps:$4 sm:$0xff]   ;;  %v1080_v33 = vld [vmem:[%s1406_s15 + $0x44] ss:$8 sps:$4 sm:$0xff]  }
  0x66   : > { %718 = vmatprep.subr.bf16.mxu1 %v1074_v29  ;;  %v1082_v34 = vld [vmem:[%s1406_s15 + $0x40] ss:$8 sps:$4 sm:$0xff]   ;;  %v1083_v35 = vld [vmem:[%s1406_s15 + $0x34] ss:$8 sps:$4 sm:$0xff]   ;;  %v1085_v36 = vld [vmem:[%s1406_s15 + $0x30] ss:$8 sps:$4 sm:$0xff]  }
  0x67   : > { %968 = vmatpush3.bf16.msra.mxu0 %v1054_v12  ;;  %v1086_v37 = vld [vmem:[%s1406_s15 + $0x24] ss:$8 sps:$4 sm:$0xff]   ;;  %v1088_v38 = vld [vmem:[%s1406_s15 + $0x20] ss:$8 sps:$4 sm:$0xff]   ;;  %v1089_v39 = vld [vmem:[%s1406_s15 + $0x14] ss:$8 sps:$4 sm:$0xff]  }
  0x68   : > { %969 = vmatprep.subr.bf16.mxu0 %v1055_v13  ;;  %v1091_v40 = vld [vmem:[%s1406_s15 + $0x10] ss:$8 sps:$4 sm:$0xff]   ;;  %v1092_v41 = vld [vmem:[%s1406_s15 + $0x4] ss:$8 sps:$4 sm:$0xff]   ;;  %v1094_v43 = vld [vmem:[%s1406_s15] ss:$8 sps:$4 sm:$0xff]  }
  0x69   : > { %719 = vmatpush1.bf16.msra.mxu1 %v1076_v30 }
  0x6a   : > { %720 = vmatprep.subr.bf16.mxu1 %v1077_v31 }
  0x6b   : > { %970 = vmatpush3.bf16.msra.mxu0 %v1056_v14 }
  0x6c   : > { %971 = vmatprep.subr.bf16.mxu0 %v1057_v15 }
  0x6d   : > { %721 = vmatpush1.bf16.msra.mxu1 %v1079_v32 }
  0x6e   : > { %722 = vmatprep.subr.bf16.mxu1 %v1080_v33 }
  0x6f   : > { %972 = vmatpush3.bf16.msra.mxu0 %v1058_v16 }
  0x70   : > { %973 = vmatprep.subr.bf16.mxu0 %v1059_v17 }
  0x71   : > { %723 = vmatpush1.bf16.msra.mxu1 %v1082_v34 }
  0x72   : > { %724 = vmatprep.subr.bf16.mxu1 %v1083_v35 }
  0x73   : > { %974 = vmatpush3.bf16.msra.mxu0 %v1060_v19 }
  0x74   : > { %975 = vmatprep.subr.bf16.mxu0 %v1061_v20  ;;  %v588_v20 = vlaneseq }
  0x75   : > { %725 = vmatpush1.bf16.msra.mxu1 %v1085_v36 }
  0x76   : > { %726 = vmatprep.subr.bf16.mxu1 %v1086_v37 }
  0x77   : > { %976 = vmatpush3.bf16.msra.mxu0 %v1062_v21  ;;  %v589_v21 = vshrl.u32 %v588_v20, 7 }
  0x78   : > { %977 = vmatprep.subr.bf16.mxu0 %v1063_v22  ;;  %v583_v22 = vld [vmem:[%s323_s10] sm:$0x1] }
  0x79   : > { %727 = vmatpush1.bf16.msra.mxu1 %v1088_v38 }
  0x7a   : > { %728 = vmatprep.subr.bf16.mxu1 %v1089_v39 }
  0x7b   : > { %978 = vmatpush3.bf16.msra.mxu0 %v1064_v23  ;;  %v590_v23 = vsub.s32 0, %v589_v21 }
  0x7d   : > { %729 = vmatpush1.bf16.msra.mxu1 %v1091_v40 }
  0x7e   : > { %538 = vmatmul.mubr.bf16.vlgmr.msra.gmra.mxu0 %v1065_v24  ;;  %730 = vmatprep.subr.bf16.mxu1 %v1092_v41 }
  0x7f   : > { %545 = vmatprep.mubr.bf16.mxu0 %v1068_v25 }
  0x81   : > { %731 = vmatpush1.bf16.msra.mxu1 %v1094_v43 }
  0x86   : > { %546 = vmatmul.mubr.bf16.gmra.mxu0 %v1070_v26  ;;  %v585_v26 = vld [vmem:[%s326_s8] sm:$0x1] }
 0x13e   : > { %v979_v44 = vpop.f32.mrf.mxu0 }
 0x140   : > { %v980_v45 = vpop.f32.mrf.mxu0 }
 0x141   : > { %v981_v50 = vadd.f32 %v980_v45, %v979_v44 }
 0x142   : > { %v982_v46 = vpop.f32.mrf.mxu0 }
 0x143   : > { %v564_v55 = vmul.f32 %v981_v50, %v981_v50 }
 0x144   : > { %v983_v47 = vpop.f32.mrf.mxu0 }
 0x145   : > { %v984_v48 = vadd.f32 %v983_v47, %v982_v46  ;;  %v610_v46 = vld [vmem:[#allocation2 + $0x30] sm:$0xff] }
 0x146   : > { %v985_v49 = vpop.f32.mrf.mxu0 }
 0x147   : > { %v565_v52 = vmul.f32 %v984_v48, %v984_v48  ;;  %v554_v56 = vadd.f32 %v984_v48, %v981_v50 }
 0x148   : > { %v986_v51 = vpop.f32.mrf.mxu0 }
 0x149   : > { %v987_v53 = vadd.f32 %v986_v51, %v985_v49  ;;  %v568_v59 = vadd.f32 %v565_v52, %v564_v55  ;;  %v612_v51 = vld [vmem:[#allocation2 + $0x18] sm:$0xff] }
 0x14a   : > { %v988_v54 = vpop.f32.mrf.mxu0 }
 0x14b   : > { %v566_v57 = vmul.f32 %v987_v53, %v987_v53  ;;  %v555_v60 = vadd.f32 %v987_v53, %v554_v56 }
 0x14c   : > { %v989_v58 = vpop.f32.mrf.mxu0 }
 0x14d   : > { %v990_v61 = vadd.f32 %v989_v58, %v988_v54  ;;  %v569_v62 = vadd.f32 %v568_v59, %v566_v57  ;;  %v614_v57 = vld [vmem:[#allocation2 + $0x8] sm:$0xff]  ;;  %v615_v59 = vld [vmem:[#allocation2 + $0x20] sm:$0xff] }
 0x14f   : > { %v556_v63 = vadd.f32 %v990_v61, %v555_v60  ;;  %v567_v0 = vmul.f32 %v990_v61, %v990_v61 }
 0x151   : > { %v557_v1 = vrot.slane %v556_v63, 4  ;;  %v570_v2 = vadd.f32 %v569_v62, %v567_v0  ;;  %v616_v62 = vld [vmem:[#allocation2 + $0x28] sm:$0xff] }
 0x153   : > { %v558_v3 = vadd.f32 %v557_v1, %v556_v63  ;;  %v571_v4 = vrot.slane %v570_v2, 4  ;;  %v617_v1 = vld [vmem:[#allocation2 + $0x38] sm:$0xff] }
 0x155   : > { %v559_v5 = vrot.slane %v558_v3, 2  ;;  %v572_v6 = vadd.f32 %v571_v4, %v570_v2 }
 0x157   : > { %v560_v7 = vadd.f32 %v559_v5, %v558_v3  ;;  %v573_v8 = vrot.slane %v572_v6, 2 }
 0x159   : > { %v561_v9 = vrot.slane %v560_v7, 1  ;;  %v574_v10 = vadd.f32 %v573_v8, %v572_v6 }
 0x15b   : > { %v562_v11 = vadd.f32 %v561_v9, %v560_v7  ;;  %v575_v12 = vrot.slane %v574_v10, 1 }
 0x15d   : > { %v563_v13 = vmul.f32 0.03125, %v562_v11  ;;  %v576_v14 = vadd.f32 %v575_v12, %v574_v10 }
 0x15f   : > { %v577_v15 = vmul.f32 0.03125, %v576_v14  ;;  %v578_v16 = vmul.f32 %v563_v13, %v563_v13 }
 0x161   : > { %v579_v17 = vsub.f32 %v577_v15, %v578_v16 }
 0x163   : > { %v580_v18 = vmax.f32 %v579_v17, 0.0 }
 0x165   : > { %v581_v19 = vadd.f32 1e-05, %v580_v18 }
 0x167   : > { %1095 = vrsqrt.f32 %v581_v19 }
 0x174   : > { %v1096_v24 = vpop.eup %1095 }
 0x175   : > { %v584_v25 = vmul.f32 %v1096_v24, %v583_v22 }
 0x177   : > { %v586_v27 = vmul.f32 %v584_v25, %v563_v13  ;;  %v591_v28 = vrot.slane %v584_v25, %v590_v23 }
 0x179   : > { %v587_v29 = vsub.f32 %v585_v26, %v586_v27  ;;  %v592_v30 = vmul.f32 %v981_v50, %v591_v28  ;;  %v593_v31 = vmul.f32 %v984_v48, %v591_v28  ;;  %v595_v35 = vmul.f32 %v990_v61, %v591_v28  ;;  %v611_v48 = vld [vmem:[#allocation2] sm:$0xff] }
 0x17a   : > { %v594_v38 = vmul.f32 %v987_v53, %v591_v28  ;;  %v613_v53 = vld [vmem:[#allocation2 + $0x10] sm:$0xff] }
 0x17b   : > { %v600_v32 = vrot.slane %v587_v29, %v590_v23 }
 0x17d   : > { %v602_v33 = vadd.f32 %v600_v32, %v592_v30  ;;  %v603_v34 = vadd.f32 %v600_v32, %v593_v31  ;;  %v604_v40 = vadd.f32 %v600_v32, %v594_v38  ;;  %v605_v41 = vadd.f32 %v600_v32, %v595_v35 }
 0x17f   : > { %v606_v36 = vmax.f32 %v602_v33, 0.0  ;;  %v607_v37 = vmax.f32 %v603_v34, 0.0  ;;  %v608_v43 = vmax.f32 %v604_v40, 0.0  ;;  %v609_v44 = vmax.f32 %v605_v41, 0.0 }
 0x181   : > { %v618_v39 = vpack.c.bf16 %v607_v37, %v606_v36  ;;  %v619_v45 = vpack.c.bf16 %v609_v44, %v608_v43 }
 0x183   : > { %749 = vmatmul.mubr.bf16.vlgmr.msra.gmra.mxu1 %v618_v39 }
 0x184   : > { %758 = vmatprep.mubr.bf16.mxu1 %v1227_v42 }
 0x18b   : > { %759 = vmatmul.mubr.bf16.gmra.mxu1 %v619_v45 }
 0x243   : > { %v750_v47 = vpop.f32.mrf.mxu1 }
 0x244   : > { %v769_v49 = vadd.f32 %v750_v47, %v610_v46 }
 0x245   : > { %v752_v50 = vpop.f32.mrf.mxu1 }
 0x246   : > { %777 = vst [vmem:[#allocation2 + $0x30] sm:$0xff] %v769_v49  ;;  %v770_v52 = vadd.f32 %v752_v50, %v611_v48 }
 0x247   : > { %v754_v54 = vpop.f32.mrf.mxu1 }
 0x248   : > { %778 = vst [vmem:[#allocation2] sm:$0xff] %v770_v52  ;;  %v771_v55 = vadd.f32 %v754_v54, %v612_v51 }
 0x249   : > { %v756_v56 = vpop.f32.mrf.mxu1 }
 0x24a   : > { %779 = vst [vmem:[#allocation2 + $0x18] sm:$0xff] %v771_v55  ;;  %v772_v42 = vadd.f32 %v756_v56, %v613_v53 }
 0x24b   : > { %v760_v58 = vpop.f32.mrf.mxu1 }
 0x24c   : > { %780 = vst [vmem:[#allocation2 + $0x10] sm:$0xff] %v772_v42  ;;  %v773_v60 = vadd.f32 %v760_v58, %v614_v57 }
 0x24d   : > { %v762_v61 = vpop.f32.mrf.mxu1 }
 0x24e   : > { %781 = vst [vmem:[#allocation2 + $0x8] sm:$0xff] %v773_v60  ;;  %v774_v63 = vadd.f32 %v762_v61, %v615_v59 }
 0x24f   : > { %v764_v0 = vpop.f32.mrf.mxu1 }
 0x250   : > { %782 = vst [vmem:[#allocation2 + $0x20] sm:$0xff] %v774_v63  ;;  %v775_v2 = vadd.f32 %v764_v0, %v616_v62  ;;  %788 = sbr.rel (%p955_p1) target bundleno = 605 (0x25d), region = 60 }
 0x251   : > { %v766_v3 = vpop.f32.mrf.mxu1 }
 0x252   : > { %783 = vst [vmem:[#allocation2 + $0x28] sm:$0xff] %v775_v2  ;;  %v776_v4 = vadd.f32 %v766_v3, %v617_v1 }
 0x254   : > { %784 = vst [vmem:[#allocation2 + $0x38] sm:$0xff] %v776_v4 }
 0x255   : > { %v789_v5 = vld [vmem:[#allocation2 + $0x30] sm:$0xff]  ;;  %v790_v6 = vld [vmem:[#allocation2] sm:$0xff]  ;;  %v791_v7 = vld [vmem:[#allocation2 + $0x18] sm:$0xff] }
 0x256   : > { %797 = vst [vmem:[#allocation8] sm:$0xff] %v789_v5  ;;  %798 = vst [vmem:[#allocation8 + $0x8] sm:$0xff] %v790_v6  ;;  %v792_v8 = vld [vmem:[#allocation2 + $0x10] sm:$0xff]  ;;  %v793_v9 = vld [vmem:[#allocation2 + $0x8] sm:$0xff] }
 0x257   : > { %799 = vst [vmem:[#allocation8 + $0x10] sm:$0xff] %v791_v7  ;;  %v794_v10 = vld [vmem:[#allocation2 + $0x20] sm:$0xff]  ;;  %800 = vst [vmem:[#allocation8 + $0x18] sm:$0xff] %v792_v8 }
 0x258   : > { %801 = vst [vmem:[#allocation8 + $0x20] sm:$0xff] %v793_v9  ;;  %802 = vst [vmem:[#allocation8 + $0x28] sm:$0xff] %v794_v10 }
 0x259   : > { %v795_v11 = vld [vmem:[#allocation2 + $0x28] sm:$0xff] }
 0x25a   : > { %803 = vst [vmem:[#allocation8 + $0x30] sm:$0xff] %v795_v11 }
 0x25b   : > { %v796_v12 = vld [vmem:[#allocation2 + $0x38] sm:$0xff] }
 0x25c   : > { %804 = vst [vmem:[#allocation8 + $0x38] sm:$0xff] %v796_v12 }
 0x25d PF: > { %p1007_p4 = scmp.eq.s32.totalorder %s1285_s25, 1  ;;  %s1228_s7 = smov [#allocation8]  }
 0x25e   : > { %s811_s10 = sshll.u32 %s1228_s7, 4  ;;  %s812_s10 = int_to_ptr.vmem [resolvable:$true] %s811_s10 }
 0x25f   : > { %s1153_s12 = scalar_lea.vmem %s812_s10, 1024  ;;  %p1160_p0 = scmp.lt.s32.totalorder %s812_s10, %s812_s10 }
 0x260   : > { %p1154_p6 = scmp.ne.s32.totalorder %s812_s10, %s1153_s12  ;;  %p1161_p13 = scmp.lt.s32.totalorder %s1153_s12, %s1153_s12 }
 0x262   : > { %p1155_p10 = pnand %p1154_p6, %p1007_p4  ;;  %p1162_p9 = por %p1161_p13, %p1160_p0 }
 0x264   : > { %p1156_p12 = pneg %p1155_p10 }
 0x266   : > { %p1163_p2 = pnand %p1162_p9, %p1156_p12 }
 0x268   : > { %1166 = shalt.err (!%p1163_p2)
}
 0x269   : > { %s1229_s13 = smov 256   ;;  %s1230_s8 = smov 16  }
 0x26a   : > { %996 = dma.vmem_to_hbm [thread:$0]  (%p1007_p4), %s812_s10, 1024, %s1516_s6, [#allocation5], %s1229_s13, %s1229_s13, %s1230_s8  }
 0x26b   : > { %1202 = dma.done.wait (%p1007_p4), [#allocation5], 1024  }
 0x26c   : > { %1204 = vsyncadd (%p1007_p4), [#allocation5], 4294966272 }
 0x26d PF: > { %p20_p3 = scmp.ge.s32.totalorder %s1288_s26, 4   ;;  %s1523_s21 = smov %s1211_s22 }
 0x26e   : > { %s1524_s22 = smov %s1215_s23  ;;  %s1525_s23 = smov %s1298_s29 }
 0x26f   : > { %s1526_s24 = smov %s1288_s26  ;;  %22 = sbr.rel (!%p20_p3) target bundleno = 6 (0x6), region = 108 }
 0x274   :  { %827 = vsyncpa [#allocation4], 1 }
 0x275   :  { %829 = vsyncpa [#allocation4 + $0x1], 1 }
 0x276   :  { %830 = vsyncpa [#allocation7], 1 }
 0x277   :  { %832 = vsyncpa [#allocation7 + $0x1], 1 }
 0x278   :  { %833 = vsyncpa [#allocation5], 1 }
 0x279   :  { %835 = vsyncpa [#allocation5 + $0x1], 1 }

</bundles_post_ra>
